<compile_context>
chip_gen: v7x
topology: tpu7x:2x2x1
jax: 0.10.0
libtpu: 0.0.40
codegen_flags: <defaults>
</compile_context>

<pallas_src>
import jax
import jax.numpy as jnp
from jax.experimental import pallas as pl
from jax.experimental.pallas import tpu as pltpu
import numpy as np


def fusion_attention_kernel(x_ref, w1_ref, b1_ref, w2_ref, vec_ref, wgt_ref):
    # x_ref:   (TB, S, D)   block of TB batch elements, x.dtype
    # w1_ref:  (D, D)       attention_matrix weight, pre-transposed, cast to x.dtype
    # b1_ref:  (1, D)       f32
    # w2_ref:  (1, D)       f32 project_weight row (bias dropped: softmax shift-invariant)
    # vec_ref: (TB, D)      attention_vec output
    # wgt_ref: (TB, S, 1)   attention_weight output (PyTorch shape, no wrapper reshape)
    TB, S, D = x_ref.shape
    x = x_ref[...]

    # One big (TB*S, D) @ (D, D) MXU matmul (native bf16 path when x is bf16), f32 acc.
    # The reshape is layout-free when S is a multiple of the sublane packing
    # (8 f32 / 16 bf16); otherwise Mosaic inserts a tile copy (still correct).
    # TODO(synk): for unaligned S, add a padded-S + mask path so the reshape stays free.
    q = jnp.dot(x.reshape(TB * S, D), w1_ref[...],
                preferred_element_type=jnp.float32)                    # (TB*S, D) f32
    q = q + b1_ref[...]
    q = jnp.where(q > 0, q, jnp.float32(0.01) * q)                     # leaky_relu, slope .01
    q3 = q.reshape(TB, S, D)

    # project_value on the VPU: multiply + lane reduce, keeps (sublane=s, lane=d) layout.
    pv = jnp.sum(q3 * w2_ref[...].reshape(1, 1, D), axis=-1, keepdims=True)  # (TB, S, 1)

    # softmax over the sequence axis (sublane reductions); exact division for parity.
    m = jnp.max(pv, axis=1, keepdims=True)                             # (TB, 1, 1)
    e = jnp.exp(pv - m)
    denom = jnp.sum(e, axis=1, keepdims=True)                          # (TB, 1, 1)
    aw = e / denom                                                     # (TB, S, 1) f32

    wgt_ref[...] = aw.astype(wgt_ref.dtype)

    # attention_vec on the VPU: weighted sum over S (mul + sublane reduce), f32 accumulate.
    av = jnp.sum((x * aw.astype(x.dtype)).astype(jnp.float32), axis=1)  # (TB, D)
    vec_ref[...] = av.astype(vec_ref.dtype)


def _vmem_capacity_bytes():
    """Physical VMEM per TensorCore (v5e/v6e: 128 MiB, v7x: 64 MiB)."""
    try:
        cap = getattr(pltpu.get_tpu_info(), "vmem_capacity_bytes", None)
        if cap:
            return int(cap)
    except Exception:
        pass
    return 64 << 20  # conservative fallback = smallest (v7x per-TC)


def _per_step_bytes(tb, S, D, x_itemsize):
    """VMEM charged per grid step: double-buffered x block, w1 and both outputs,
    plus the f32 q intermediate (counted twice for pre/post-activation liveness)."""
    x_blk = tb * S * D * x_itemsize
    q_f32 = tb * S * D * 4
    w1_b = D * D * x_itemsize
    outs = tb * (D + S) * x_itemsize
    misc = 2 * 2 * D * 4                  # b1, w2 (double-buffered)
    return 2 * x_blk + 2 * q_f32 + 2 * w1_b + 2 * outs + misc + (1 << 20)


def _pick_tb(B, S, D, x_itemsize, budget):
    """Largest divisor of B whose per-step footprint fits `budget`, preferring
    sublane-aligned tiles and a grid of >= 2 steps (keeps both v7x TensorCores busy)."""
    divs = [c for c in range(1, B + 1) if B % c == 0]
    fits = [c for c in divs if _per_step_bytes(c, S, D, x_itemsize) <= budget]
    tiers = [
        [c for c in fits if B // c >= 2 and c % 8 == 0],
        [c for c in fits if B // c >= 2],
        fits,
        [1],
    ]
    for t in tiers:
        if t:
            return max(t)
    return 1


def fusion_attention(x, w1, b1, w2, b2=None, *, tb=None):
    """x: (B, S, D); w1: (D, D) [torch Linear weight], b1: (D,), w2: (1, D), b2: (1,).

    Returns (attention_vec (B, D), attention_weight (B, S, 1)) like the PyTorch module.
    b2 is accepted for API parity but unused: adding a constant to every logit is a
    no-op under softmax, so both outputs are unchanged.
    """
    B, S, D = x.shape
    x_itemsize = jnp.dtype(x.dtype).itemsize

    cap = _vmem_capacity_bytes()
    budget = max(cap // 3, 12 << 20)          # generation-aware tiling budget
    if tb is None:
        tb = _pick_tb(B, S, D, x_itemsize, budget)
    assert B % tb == 0, f"tb={tb} must divide B={B}"

    est = _per_step_bytes(tb, S, D, x_itemsize)
    vmem_limit = int(min(cap * 3 // 4, max(32 << 20, 2 * est)))

    # Pre-transpose torch Linear weights so the kernel does plain x @ W. w1 is cast to
    # x.dtype so the MXU stays on the native bf16 path when x is bf16; b1/w2 stay f32
    # for the f32 epilogue.
    w1_t = jnp.asarray(w1).astype(x.dtype).T.reshape(D, D)
    b1_r = jnp.asarray(b1).astype(jnp.float32).reshape(1, D)
    w2_r = jnp.asarray(w2).astype(jnp.float32).reshape(1, D)

    cost = pl.CostEstimate(
        flops=2 * B * S * D * D + 6 * B * S * D,
        transcendentals=B * S,
        bytes_accessed=(B * S * D + D * D + B * D + B * S) * x_itemsize,
    )

    # NOTE: outputs are tiny relative to the x stream, so the lane-dense output-packing
    # trick ((tb, D+S) slab) is skipped to keep lowering simple.
    # TODO(synk): for very large S, add an S grid axis with online-softmax (m/l/acc)
    # accumulators so the (TB*S, D) f32 q intermediate stays bounded on v7x (64 MiB VMEM).
    vec, wgt = pl.pallas_call(
        fusion_attention_kernel,
        out_shape=(
            jax.ShapeDtypeStruct((B, D), x.dtype),
            jax.ShapeDtypeStruct((B, S, 1), x.dtype),
        ),
        grid_spec=pltpu.PrefetchScalarGridSpec(
            num_scalar_prefetch=0,
            grid=(B // tb,),
            in_specs=[
                pl.BlockSpec((tb, S, D), lambda b: (b, 0, 0)),
                pl.BlockSpec((D, D), lambda b: (0, 0)),
                pl.BlockSpec((1, D), lambda b: (0, 0)),
                pl.BlockSpec((1, D), lambda b: (0, 0)),
            ],
            out_specs=[
                pl.BlockSpec((tb, D), lambda b: (b, 0)),
                pl.BlockSpec((tb, S, 1), lambda b: (b, 0, 0)),
            ],
        ),
        compiler_params=pltpu.CompilerParams(
            dimension_semantics=("parallel",),
            vmem_limit_bytes=vmem_limit,
        ),
        cost_estimate=cost,
    )(x, w1_t, b1_r, w2_r)

    return vec, wgt


def _reference(x, w1, b1, w2, b2):
    # Pure-JAX reference mirroring the PyTorch forward (includes b2, verifying the
    # shift-invariance argument for dropping it in the kernel).
    hp = jax.lax.Precision.HIGHEST
    q = jnp.einsum("bsd,ed->bse", x, w1, precision=hp) + b1
    q = jnp.where(q > 0, q, 0.01 * q)
    pv = jnp.einsum("bse,oe->bso", q, w2, precision=hp) + b2       # (B, S, 1)
    aw = jax.nn.softmax(pv, axis=1)
    av = jnp.sum(x * aw, axis=1)
    return av, aw


if __name__ == "__main__":
    B, S, D = 16, 8, 32
    key = jax.random.PRNGKey(0)
    kx, kw1, kb1, kw2, kb2 = jax.random.split(key, 5)

    x = jax.random.normal(kx, (B, S, D), dtype=jnp.float32)

    # Deterministic init mimicking torch.nn.Linear defaults: U(-1/sqrt(fan_in), 1/sqrt(fan_in))
    bound1 = 1.0 / np.sqrt(D)
    w1 = jax.random.uniform(kw1, (D, D), minval=-bound1, maxval=bound1, dtype=jnp.float32)
    b1 = jax.random.uniform(kb1, (D,),   minval=-bound1, maxval=bound1, dtype=jnp.float32)
    w2 = jax.random.uniform(kw2, (1, D), minval=-bound1, maxval=bound1, dtype=jnp.float32)
    b2 = jax.random.uniform(kb2, (1,),   minval=-bound1, maxval=bound1, dtype=jnp.float32)

    vec, wgt = fusion_attention(x, w1, b1, w2, b2)   # auto tb=8 -> grid=(2,)
    jax.block_until_ready((vec, wgt))

    vec_ref, wgt_ref = _reference(x, w1, b1, w2, b2)
    # Exact softmax division (no approx reciprocal) + f32 path -> tight tolerance.
    np.testing.assert_allclose(np.asarray(vec), np.asarray(vec_ref), rtol=1e-4, atol=1e-4)
    np.testing.assert_allclose(np.asarray(wgt), np.asarray(wgt_ref), rtol=1e-4, atol=1e-4)

    assert vec.shape == (B, D) and wgt.shape == (B, S, 1)
    print("KERNEL_OK")
</pallas_src>

<mosaic_0001>
module attributes {stable_mosaic.version = 11 : i64} {
  func.func @fusion_attention_kernel(%arg0: i32, %arg1: memref<8x8x32xf32, #tpu.memory_space<vmem>>, %arg2: memref<32x32xf32, #tpu.memory_space<vmem>>, %arg3: memref<1x32xf32, #tpu.memory_space<vmem>>, %arg4: memref<1x32xf32, #tpu.memory_space<vmem>>, %arg5: memref<8x32xf32, #tpu.memory_space<vmem>>, %arg6: memref<8x8x1xf32, #tpu.memory_space<vmem>>) attributes {dimension_semantics = [#tpu.dimension_semantics<parallel>], iteration_bounds = array<i64: 2>, scalar_prefetch = 0 : i64, scratch_operands = 0 : i64, tpu.core_type = #tpu.core_type<tc>, window_params = [{transform_indices = @transform_0, window_bounds = array<i64: 8, 8, 32>}, {pipeline_mode = #tpu.pipeline_mode<synchronous>, transform_indices = @transform_1, window_bounds = array<i64: 32, 32>}, {pipeline_mode = #tpu.pipeline_mode<synchronous>, transform_indices = @transform_2, window_bounds = array<i64: 1, 32>}, {pipeline_mode = #tpu.pipeline_mode<synchronous>, transform_indices = @transform_3, window_bounds = array<i64: 1, 32>}, {transform_indices = @transform_4, window_bounds = array<i64: 8, 32>}, {transform_indices = @transform_5, window_bounds = array<i64: 8, 8, 1>}]} {
    %c0 = arith.constant 0 : index
    %c0_0 = arith.constant 0 : index
    %c0_1 = arith.constant 0 : index
    %0 = vector.load %arg1[%c0, %c0_0, %c0_1] : memref<8x8x32xf32, #tpu.memory_space<vmem>>, vector<8x8x32xf32>
    %1 = vector.shape_cast %0 : vector<8x8x32xf32> to vector<64x32xf32>
    %c0_2 = arith.constant 0 : index
    %c0_3 = arith.constant 0 : index
    %2 = vector.load %arg2[%c0_2, %c0_3] : memref<32x32xf32, #tpu.memory_space<vmem>>, vector<32x32xf32>
    %cst = arith.constant dense<0.000000e+00> : vector<64x32xf32>
    %3 = tpu.matmul %1, %2, %cst {dimension_numbers = #tpu.dot_dimension_numbers<[1], [0], [0], [1], [0, 0, 1, 1], [], []>} : vector<64x32xf32>, vector<32x32xf32>, vector<64x32xf32> -> vector<64x32xf32>
    %c0_4 = arith.constant 0 : index
    %c0_5 = arith.constant 0 : index
    %4 = vector.load %arg3[%c0_4, %c0_5] : memref<1x32xf32, #tpu.memory_space<vmem>>, vector<1x32xf32>
    %5 = vector.broadcast %4 : vector<1x32xf32> to vector<64x32xf32>
    %6 = arith.addf %3, %5 : vector<64x32xf32>
    %cst_6 = arith.constant 0.000000e+00 : f32
    %7 = vector.broadcast %cst_6 : f32 to vector<64x32xf32>
    %8 = arith.cmpf ogt, %6, %7 : vector<64x32xf32>
    %cst_7 = arith.constant 0.00999999977 : f32
    %9 = vector.broadcast %cst_7 : f32 to vector<64x32xf32>
    %10 = arith.mulf %9, %6 : vector<64x32xf32>
    %11 = arith.select %8, %6, %10 : vector<64x32xi1>, vector<64x32xf32>
    %12 = vector.shape_cast %11 : vector<64x32xf32> to vector<8x8x32xf32>
    %c0_8 = arith.constant 0 : index
    %c0_9 = arith.constant 0 : index
    %13 = vector.load %arg4[%c0_8, %c0_9] : memref<1x32xf32, #tpu.memory_space<vmem>>, vector<1x32xf32>
    %14 = vector.shape_cast %13 : vector<1x32xf32> to vector<1x1x32xf32>
    %15 = vector.broadcast %14 : vector<1x1x32xf32> to vector<8x8x32xf32>
    %16 = arith.mulf %12, %15 : vector<8x8x32xf32>
    %cst_10 = arith.constant dense<0.000000e+00> : vector<8x8xf32>
    %17 = vector.multi_reduction <add>, %16, %cst_10 [2] : vector<8x8x32xf32> to vector<8x8xf32>
    %18 = vector.shape_cast %17 : vector<8x8xf32> to vector<8x8x1xf32>
    %cst_11 = arith.constant dense<0xFF800000> : vector<8x1xf32>
    %19 = vector.multi_reduction <maximumf>, %18, %cst_11 [1] : vector<8x8x1xf32> to vector<8x1xf32>
    %20 = vector.shape_cast %19 : vector<8x1xf32> to vector<8x1x1xf32>
    %21 = vector.broadcast %20 : vector<8x1x1xf32> to vector<8x8x1xf32>
    %22 = arith.subf %18, %21 : vector<8x8x1xf32>
    %23 = math.exp %22 : vector<8x8x1xf32>
    %cst_12 = arith.constant dense<0.000000e+00> : vector<8x1xf32>
    %24 = vector.multi_reduction <add>, %23, %cst_12 [1] : vector<8x8x1xf32> to vector<8x1xf32>
    %25 = vector.shape_cast %24 : vector<8x1xf32> to vector<8x1x1xf32>
    %26 = vector.broadcast %25 : vector<8x1x1xf32> to vector<8x8x1xf32>
    %27 = arith.divf %23, %26 : vector<8x8x1xf32>
    %c0_13 = arith.constant 0 : index
    %c0_14 = arith.constant 0 : index
    %c0_15 = arith.constant 0 : index
    %28 = vector.load %arg6[%c0_13, %c0_14, %c0_15] : memref<8x8x1xf32, #tpu.memory_space<vmem>>, vector<8x8x1xf32>
    tpu.vector_store %arg6[%c0_13, %c0_14, %c0_15], %27 {strides = array<i32>} : memref<8x8x1xf32, #tpu.memory_space<vmem>>, vector<8x8x1xf32>,
    %29 = vector.broadcast %27 : vector<8x8x1xf32> to vector<8x8x32xf32>
    %30 = arith.mulf %0, %29 : vector<8x8x32xf32>
    %cst_16 = arith.constant dense<0.000000e+00> : vector<8x32xf32>
    %31 = vector.multi_reduction <add>, %30, %cst_16 [1] : vector<8x8x32xf32> to vector<8x32xf32>
    %c0_17 = arith.constant 0 : index
    %c0_18 = arith.constant 0 : index
    %32 = vector.load %arg5[%c0_17, %c0_18] : memref<8x32xf32, #tpu.memory_space<vmem>>, vector<8x32xf32>
    tpu.vector_store %arg5[%c0_17, %c0_18], %31 {strides = array<i32>} : memref<8x32xf32, #tpu.memory_space<vmem>>, vector<8x32xf32>,
    return
  }
  func.func @transform_0(%arg0: i32) -> (i32, i32, i32) {
    %c0_i32 = arith.constant 0 : i32
    %c0_i32_0 = arith.constant 0 : i32
    %c0_i32_1 = arith.constant 0 : i32
    return %arg0, %c0_i32, %c0_i32_0 : i32, i32, i32
  }
  func.func @transform_1(%arg0: i32) -> (i32, i32) {
    %c0_i32 = arith.constant 0 : i32
    %c0_i32_0 = arith.constant 0 : i32
    %c0_i32_1 = arith.constant 0 : i32
    return %c0_i32, %c0_i32_0 : i32, i32
  }
  func.func @transform_2(%arg0: i32) -> (i32, i32) {
    %c0_i32 = arith.constant 0 : i32
    %c0_i32_0 = arith.constant 0 : i32
    %c0_i32_1 = arith.constant 0 : i32
    return %c0_i32, %c0_i32_0 : i32, i32
  }
  func.func @transform_3(%arg0: i32) -> (i32, i32) {
    %c0_i32 = arith.constant 0 : i32
    %c0_i32_0 = arith.constant 0 : i32
    %c0_i32_1 = arith.constant 0 : i32
    return %c0_i32, %c0_i32_0 : i32, i32
  }
  func.func @transform_4(%arg0: i32) -> (i32, i32) {
    %c0_i32 = arith.constant 0 : i32
    %c0_i32_0 = arith.constant 0 : i32
    return %arg0, %c0_i32 : i32, i32
  }
  func.func @transform_5(%arg0: i32) -> (i32, i32, i32) {
    %c0_i32 = arith.constant 0 : i32
    %c0_i32_0 = arith.constant 0 : i32
    %c0_i32_1 = arith.constant 0 : i32
    return %arg0, %c0_i32, %c0_i32_0 : i32, i32, i32
  }
}

</mosaic_0001>

<bundles_post_ra>
// kernel: tpu_custom_call.1
= control target key start
LH: loop header
LB: loop body
LE: loop exit
PB: predicated region body
PF: predicated region fallthrough
CT: control target
= control target key end

     0   :  { %11 = vsyncpa [#allocation3], 0  ;;  %s1523_s0 = inlined_call_operand.hbm [shape: f32[16,8,32], index: 0, kind: input, shape index: {}]   ;;  %s1524_s1 = inlined_call_operand.hbm [shape: f32[32,32], index: 1, kind: input, shape index: {}]   ;;  %s1525_s2 = inlined_call_operand.vmem [shape: f32[1,32], index: 2, kind: input, shape index: {}]   ;;  %s1526_s3 = inlined_call_operand.vmem [shape: f32[1,32], index: 3, kind: input, shape index: {}]   ;;  %s1527_s4 = inlined_call_operand.hbm [shape: f32[16,32], index: 4, kind: output, shape index: {0}]   ;;  %s1528_s5 = inlined_call_operand.vmem [shape: f32[16,8,1], index: 5, kind: output, shape index: {1}]  }
   0x1   :  { %13 = vsyncpa [#allocation3 + $0x1], 0 }
   0x2   :  { %14 = vsyncpa [#allocation6], 0 }
   0x3   :  { %15 = vsyncpa [#allocation4], 0 }
   0x4   :  { %17 = vsyncpa [#allocation4 + $0x1], 0  ;;  %s1174_s18 = smov 0   ;;  %s1176_s19 = smov 0  }
   0x5   :  { %s1178_s20 = smov 0   ;;  %s1180_s21 = smov 0  }
   0x6 LB: > { %s1195_s22 = sadd.s32 4294967295, %s1137_s21   ;;  %s846_s23 = sadd.s32 4294967294, %s1137_s21   ;;  %s1137_s21 = sphi %s1180_s21, %s1549_s21   ;;  %s1133_s20 = sphi %s1178_s20, %s1548_s20   ;;  %s1129_s19 = sphi %s1176_s19, %s1547_s19   ;;  %s1125_s18 = sphi %s1174_s18, %s1546_s18  }
   0x7   : > { %p43_p0 = scmp.ne.s32.totalorder %s1129_s19, %s1125_s18  ;;  %p1529_p1 = scmp.eq.s32.totalorder %s1195_s22, 0 }
   0x8   : > { %p136_p3 = scmp.eq.s32.totalorder %s846_s23, 1  ;;  %p847_p5 = scmp.ge.s32.totalorder %s1137_s21, 1 }
   0x9   : > { %p1204_p4 = por %p1529_p1, %p43_p0  ;;  %p169_p7 = scmp.lt.s32.totalorder %s1137_s21, 3 }
   0xa   : > { %p1209_p6 = por %p136_p3, %p43_p0  ;;  %s1139_s27 = smov [#allocation5]  }
   0xb   : > { %s1532_s24 = scalar_select %p1204_p4, 1, 0 }
   0xc   : > { %s1533_s25 = scalar_select %p1209_p6, 1, 0 }
   0xd   : > { %p1214_p8 = pnand %p847_p5, %p169_p7  ;;  %s181_s28 = sshll.u32 %s1139_s27, 4  ;;  %s1218_s28 = int_to_ptr.vmem [resolvable:$true] %s181_s28 }
   0xe   : > { %s1230_s30 = sadd.s32 1, %s1137_s21   ;;  %s30_s6 = sadd.s32 1, %s1133_s20 }
   0xf   : > { %s1534_s26 = scalar_select %p1214_p8, 1, 0 }
  0x10   : > { %p926_p9 = pneg %p1214_p8  ;;  %s27_s7 = ssub.s32 %s1137_s21, %s1230_s30 }
  0x11   : > { %s1009_s10 = scalar_lea.hbm %s1524_s1, 512 }
  0x12   : > { %p1225_p11 = pnand %p926_p9, %p1529_p1  ;;  %p1010_p12 = scmp.ne.s32.totalorder %s1524_s1, %s1009_s10 }
  0x13   : > { %p1016_p5 = scmp.lt.u32.totalorder %s1009_s10, %s1524_s1 }
  0x14   : > { %p1011_p13 = pneg %p1225_p11 }
  0x16   : > { %p1012_p0 = pnand %p1011_p13, %p1010_p12 }
  0x18   : > { %p1013_p3 = pneg %p1012_p0 }
  0x1a   : > { %p1018_p7 = pnand %p1016_p5, %p1013_p3 }
  0x1c   : > { %1021 = shalt.err (!%p1018_p7)
}
  0x1d   : > { %s1022_s15 = scalar_lea.vmem %s1218_s28, 512  ;;  %p1030_p2 = scmp.lt.s32.totalorder %s1218_s28, %s1218_s28 }
  0x1e   : > { %p1023_p9 = scmp.ne.s32.totalorder %s1218_s28, %s1022_s15  ;;  %p1031_p6 = scmp.lt.s32.totalorder %s1022_s15, %s1022_s15 }
  0x20   : > { %p1025_p10 = pnand %p1023_p9, %p1011_p13  ;;  %p1032_p4 = por %p1031_p6, %p1030_p2 }
  0x22   : > { %p1026_p1 = pneg %p1025_p10 }
  0x24   : > { %p1033_p8 = pnand %p1032_p4, %p1026_p1 }
  0x26   : > { %1036 = shalt.err (!%p1033_p8)
}
  0x27   : > { %s1140_s16 = smov 128   ;;  %s1141_s17 = smov 8  }
  0x28   : > { %929 = dma.hbm_to_vmem [thread:$0]  (!%p1225_p11), %s1524_s1, 512, %s1218_s28, [#allocation6], %s1140_s16, %s1140_s16, %s1141_s17  }
  0x29   : > { %p28_p1 = scmp.eq.s32.totalorder %s27_s7, 0  ;;  %p37_p2 = scmp.ne.s32.totalorder %s1133_s20, %s1129_s19 }
  0x2a   : > { %p38_p4 = scmp.eq.s32.totalorder %s1137_s21, 0  ;;  %p939_p6 = scmp.lt.s32.totalorder %s1137_s21, 2 }
  0x2b   : > { %s1264_s8 = scalar_select %p28_p1, %s1133_s20, %s30_s6  }
  0x2c   : > { %p39_p8 = por %p38_p4, %p37_p2  ;;  %p1536_p10 = scmp.eq.s32.totalorder %s1195_s22, 1 }
  0x2d   : > { %s201_s29 = sand.u32 1, %s1133_s20   ;;  %s873_s10 = sshll.u32 %s1137_s21, 10 }
  0x2e   : > { %p1268_p12 = por %p1536_p10, %p37_p2  ;;  %s850_s11 = sshll.u32 %s201_s29, 6 }
  0x2f   : > { %s1277_s14 = scalar_lea.hbm %s1523_s0, %s873_s10  ;;  %s205_s28 = scalar_lea.vmem [#allocation2], %s850_s11 }
  0x30   : > { %s212_s6 = sshll.u32 %s205_s28, 4  ;;  %p1279_p11 = pnand %p939_p6, %p39_p8  ;;  %s1283_s6 = int_to_ptr.vmem [resolvable:$true] %s212_s6 }
  0x31   : > { %s1285_s15 = scalar_lea.sflag [#allocation3], %s201_s29  ;;  %s1037_s23 = scalar_lea.hbm %s1277_s14, 1024 }
  0x32   : > { %p1038_p13 = scmp.ne.s32.totalorder %s1277_s14, %s1037_s23  ;;  %p1039_p0 = pneg %p1279_p11 }
  0x33   : > { %s1042_s11 = scalar_lea.hbm %s1523_s0, 2048  ;;  %p1043_p7 = scmp.lt.u32.totalorder %s1277_s14, %s1523_s0 }
  0x34   : > { %p1040_p3 = pnand %p1039_p0, %p1038_p13  ;;  %p1044_p9 = scmp.lt.u32.totalorder %s1042_s11, %s1037_s23 }
  0x35   : > { %p1046_p2 = scmp.lt.u32.totalorder %s1037_s23, %s1277_s14 }
  0x36   : > { %p1041_p5 = pneg %p1040_p3  ;;  %p1045_p1 = por %p1044_p9, %p1043_p7 }
  0x38   : > { %p1047_p4 = por %p1046_p2, %p1045_p1 }
  0x3a   : > { %p1048_p6 = pnand %p1047_p4, %p1041_p5 }
  0x3c   : > { %1051 = shalt.err (!%p1048_p6)
}
  0x3d   : > { %s1052_s29 = scalar_lea.vmem %s1283_s6, 1024  ;;  %s1142_s28 = smov [#allocation2]  }
  0x3e   : > { %p1053_p8 = scmp.ne.s32.totalorder %s1283_s6, %s1052_s29  ;;  %s1057_s27 = sshll.u32 %s1142_s28, 4  ;;  %s1058_s27 = int_to_ptr.vmem [resolvable:$false] %s1057_s27 }
  0x3f   : > { %s1059_s10 = scalar_lea.vmem %s1058_s27, 2048  ;;  %p1060_p3 = scmp.lt.s32.totalorder %s1283_s6, %s1058_s27 }
  0x40   : > { %p1055_p10 = pnand %p1053_p8, %p1039_p0  ;;  %p1061_p7 = scmp.lt.s32.totalorder %s1059_s10, %s1052_s29 }
  0x42   : > { %p1056_p13 = pneg %p1055_p10  ;;  %p1062_p9 = por %p1061_p7, %p1060_p3 }
  0x44   : > { %p1063_p1 = pnand %p1062_p9, %p1056_p13 }
  0x46   : > { %1066 = shalt.err (!%p1063_p1)
}
  0x47   : > { %933 = dma.hbm_to_vmem [thread:$0]  (!%p1279_p11), %s1277_s14, 1024, %s1283_s6, %s1285_s15, %s1140_s16, %s1140_s16, %s1141_s17  }
  0x48   : > { %p1539_p0 = scmp.ne.s32.totalorder %s1534_s26, 0 }
  0x49   : > { %s1319_s23 = sand.u32 (!%p1539_p0), 1, %s1129_s19   ;;  %p1540_p5 = scmp.ne.s32.totalorder (!%p1539_p0), %s1532_s24, 0 }
  0x4a   : > { %224 = sbr.rel (%p1539_p0) target bundleno = 558 (0x22e), region = 36  ;;  %s854_s11 = sshll.u32 (!%p1539_p0), %s1319_s23, 6 }
  0x4b   : > { %s227_s12 = scalar_lea.sflag (!%p1539_p0), [#allocation3], %s1319_s23  ;;  %s1323_s13 = scalar_lea.vmem (!%p1539_p0), [#allocation2], %s854_s11 }
  0x51   : > { %1112 = dma.done.wait (%p1540_p5), %s227_s12, 1024  }
  0x52   : > { %1114 = vsyncadd (%p1540_p5), %s227_s12, 4294966272  ;;  %p1541_p11 = scmp.eq.s32.totalorder %s1195_s22, 0 }
  0x54   : > { %1116 = dma.done.wait (%p1541_p11), [#allocation6], 512   ;;  %p1542_p2 = pmov %p1541_p11 }
  0x55   : > { %vm292_vm0 = vcmask 261120   ;;  %v281_v0 = vld [vmem:[#allocation5] sm:$0xff]  ;;  %v282_v1 = vld [vmem:[#allocation5 + $0x8] sm:$0xff]  ;;  %v283_v2 = vld [vmem:[#allocation5 + $0x10] sm:$0xff]  ;;  %s857_s14 = sshll.u32 %s1195_s22, 3  ;;  %vm621_vm9 = vcmask 7168  }
  0x56   : > { %1118 = vsyncadd (%p1542_p2), [#allocation6], 4294966784  ;;  %v906_v3 = vpack.c.bf16 %v282_v1, %v281_v0  ;;  %v284_v4 = vld [vmem:[#allocation5 + $0x18] sm:$0xff]  ;;  %v1334_v5 = vld [vmem:[%s1323_s13] sm:$0xff]  ;;  %p1408_p4 = scmp.lt.s32.totalorder %s857_s14, 15  ;;  %vm702_vm10 = vcmask 1041409  }
  0x57   : > { %v910_v6 = vpack.c.bf16 %v284_v4, %v283_v2  ;;  %894 = vmatprep.mubr.msk.f32.mxu0 %vm292_vm0, %v1334_v5  ;;  %v1339_v7 = vld [vmem:[%s1323_s13 + $0x20] sm:$0xff]  ;;  %v1344_v8 = vld [vmem:[%s1323_s13 + $0x8] sm:$0xff]  ;;  %v1350_v10 = vld [vmem:[%s1323_s13 + $0x10] sm:$0xff]  ;;  %vm704_vm11 = vcmask 1042434   ;;  %vm706_vm12 = vcmask 1043459   ;;  %s856_s27 = sshll.u32 %s1319_s23, 3 }
  0x58   : > { %907 = vmatprep.subr.bf16.mxu0 %v906_v3  ;;  %914 = vmatprep.subr.bf16.mxu1 %v906_v3  ;;  %v1347_v9 = vld [vmem:[%s1323_s13 + $0x28] sm:$0xff]  ;;  %v1353_v11 = vld [vmem:[%s1323_s13 + $0x30] sm:$0xff]  ;;  %v1362_v12 = vld [vmem:[%s1323_s13 + $0x18] sm:$0xff]  ;;  %s1551_s14 = smov (!%p1408_p4, %s857_s14), 15  ;;  %vm708_vm13 = vcmask 1044484   ;;  %vm710_vm14 = vcmask 1045509  }
  0x59   : > { %909 = vmatpush3.bf16.msra.mxu0 %v906_v3  ;;  %916 = vmatpush3.bf16.msra.mxu1 %v906_v3  ;;  %v1367_v13 = vld [vmem:[%s1323_s13 + $0x38] sm:$0xff]  ;;  %v859_v14 = vld [vmem:[%s1525_s2] ss:$0 sm:$0xff]  ;;  %s858_s7 = sshll.u32 %s1551_s14, 3  ;;  %vm712_vm15 = vcmask 1046534   ;;  %s870_s10 = sshll.u32 %s1195_s22, 7 }
  0x5a   : > { %911 = vmatprep.subr.bf16.mxu0 %v910_v6  ;;  %915 = vmatprep.subr.bf16.mxu1 %v910_v6  ;;  %v868_v24 = vld [vmem:[%s1526_s3] ss:$0 sm:$0xff]  ;;  %s1430_s28 = scalar_lea.vmem %s1528_s5, %s858_s7  ;;  %s258_s11 = scalar_lea.vmem [#allocation7], %s856_s27 }
  0x5b   : > { %900 = vmatprep.mubr.msk.f32.mxu1 %vm292_vm0, %v1339_v7  ;;  %s737_s12 = sshll.u32 %s258_s11, 4  ;;  %s1478_s26 = scalar_lea.hbm %s1527_s4, %s870_s10  ;;  %s1480_s12 = int_to_ptr.vmem [resolvable:$true] %s737_s12 }
  0x5c   : > { %s719_s16 = scalar_lea.sflag [#allocation4], %s1319_s23  ;;  %s1067_s22 = scalar_lea.vmem %s1480_s12, 128 }
  0x5d   : > { %913 = vmatpush3.bf16.msra.mxu0 %v910_v6  ;;  %917 = vmatpush3.bf16.msra.mxu1 %v910_v6  ;;  %p1068_p6 = scmp.ne.s32.totalorder %s1480_s12, %s1067_s22  ;;  %s1143_s17 = smov [#allocation7]  }
  0x5e   : > { %s1071_s14 = sshll.u32 %s1143_s17, 4  ;;  %s1072_s14 = int_to_ptr.vmem [resolvable:$false] %s1071_s14 }
  0x5f   : > { %p1069_p8 = pnand %p1068_p6, %p1268_p12  ;;  %s1073_s6 = scalar_lea.vmem %s1072_s14, 256 }
  0x60   : > { %895 = vmatmul.mubr.msk.f32.vlgmr.msra.gmra.mrb[0].mxu0 %vm292_vm0, %v1344_v8  ;;  %901 = vmatmul.mubr.msk.f32.vlgmr.msra.gmra.mrb[0].mxu1 %vm292_vm0, %v1347_v9  ;;  %p1074_p13 = scmp.lt.s32.totalorder %s1480_s12, %s1072_s14  ;;  %p1075_p3 = scmp.lt.s32.totalorder %s1073_s6, %s1067_s22 }
  0x61   : > { %897 = vmatprep.mubr.msk.f32.mxu0 %vm292_vm0, %v1350_v10  ;;  %903 = vmatprep.mubr.msk.f32.mxu1 %vm292_vm0, %v1353_v11  ;;  %p1070_p10 = pneg %p1069_p8 }
  0x62   : > { %p1076_p7 = por %p1075_p3, %p1074_p13 }
  0x64   : > { %898 = vmatmul.mubr.msk.f32.gmra.mrb[2].mxu0 %vm292_vm0, %v1362_v12  ;;  %904 = vmatmul.mubr.msk.f32.gmra.mrb[2].mxu1 %vm292_vm0, %v1367_v13  ;;  %p1077_p9 = pnand %p1076_p7, %p1070_p10 }
 0x133   : > { %v896_v15 = vpop.f32.mrb[0].mxu0  ;;  %v902_v16 = vpop.f32.mrb[0].mxu1 }
 0x134   : > { %v389_v17 = vadd.f32 %v896_v15, %v859_v14  ;;  %v383_v18 = vpop.f32.mrb[1].mxu0  ;;  %v403_v19 = vpop.f32.mrb[1].mxu1  ;;  %v409_v23 = vadd.f32 %v902_v16, %v859_v14 }
 0x135   : > { %v384_v20 = vadd.f32 %v859_v14, %v383_v18  ;;  %v404_v21 = vadd.f32 %v859_v14, %v403_v19 }
 0x136   : > { %v431_v22 = vmul.f32 0.01, %v389_v17  ;;  %vm423_vm1 = vcmp.gt.f32.partialorder %v389_v17, 0.0  ;;  %v435_v38 = vmul.f32 0.01, %v409_v23  ;;  %vm427_vm7 = vcmp.gt.f32.partialorder %v409_v23, 0.0 }
 0x137   : > { %vm422_vm2 = vcmp.gt.f32.partialorder %v384_v20, 0.0  ;;  %v430_v25 = vmul.f32 0.01, %v384_v20  ;;  %v899_v26 = vpop.f32.mrb[2].mxu0  ;;  %v905_v27 = vpop.f32.mrb[2].mxu1  ;;  %vm426_vm3 = vcmp.gt.f32.partialorder %v404_v21, 0.0 }
 0x138   : > { %v399_v28 = vadd.f32 %v899_v26, %v859_v14  ;;  %v393_v29 = vpop.f32.mrb[3].mxu0  ;;  %v434_v30 = vmul.f32 0.01, %v404_v21  ;;  %v439_v31 = vsel %vm423_vm1, %v389_v17, %v431_v22  ;;  %v413_v32 = vpop.f32.mrb[3].mxu1  ;;  %v419_v39 = vadd.f32 %v905_v27, %v859_v14 }
 0x139   : > { %v394_v33 = vadd.f32 %v859_v14, %v393_v29  ;;  %v454_v34 = vmul.f32 %v868_v24, %v439_v31  ;;  %v414_v35 = vadd.f32 %v859_v14, %v413_v32  ;;  %v438_v36 = vsel %vm422_vm2, %v384_v20, %v430_v25 }
 0x13a   : > { %v433_v37 = vmul.f32 0.01, %v399_v28  ;;  %vm425_vm4 = vcmp.gt.f32.partialorder %v399_v28, 0.0  ;;  %v453_v44 = vmul.f32 %v868_v24, %v438_v36  ;;  %v442_v45 = vsel %vm426_vm3, %v404_v21, %v434_v30 }
 0x13b   : > { %vm424_vm5 = vcmp.gt.f32.partialorder %v394_v33, 0.0  ;;  %v432_v40 = vmul.f32 0.01, %v394_v33  ;;  %v464_v41 = vsel %vm292_vm0, %v454_v34, 0.0  ;;  %vm428_vm6 = vcmp.gt.f32.partialorder %v414_v35, 0.0 }
 0x13c   : > { %465 = vadd.xlane.f32.xlu0 %v464_v41  ;;  %v436_v42 = vmul.f32 0.01, %v414_v35  ;;  %v441_v43 = vsel %vm425_vm4, %v399_v28, %v433_v37  ;;  %v457_v48 = vmul.f32 %v868_v24, %v442_v45  ;;  %v461_v51 = vsel %vm292_vm0, %v453_v44, 0.0 }
 0x13d   : > { %v456_v46 = vmul.f32 %v868_v24, %v441_v43  ;;  %v440_v47 = vsel %vm424_vm5, %v394_v33, %v432_v40  ;;  %v437_v53 = vmul.f32 0.01, %v419_v39  ;;  %v443_v54 = vsel %vm427_vm7, %v409_v23, %v435_v38 }
 0x13e   : > { %v444_v49 = vsel %vm428_vm6, %v414_v35, %v436_v42  ;;  %v455_v52 = vmul.f32 %v868_v24, %v440_v47  ;;  %vm429_vm8 = vcmp.gt.f32.partialorder %v419_v39, 0.0  ;;  %v473_v55 = vsel %vm292_vm0, %v457_v48, 0.0 }
 0x13f   : > { %v470_v50 = vsel %vm292_vm0, %v456_v46, 0.0  ;;  %v459_v56 = vmul.f32 %v868_v24, %v444_v49  ;;  %v458_v58 = vmul.f32 %v868_v24, %v443_v54  ;;  %v445_v59 = vsel %vm429_vm8, %v419_v39, %v437_v53 }
 0x140   : > { %471 = vadd.xlane.f32.xlu1 %v470_v50  ;;  %462 = vadd.xlane.f32.xlu0 %v461_v51  ;;  %v467_v57 = vsel %vm292_vm0, %v455_v52, 0.0  ;;  %v460_v62 = vmul.f32 %v868_v24, %v445_v59  ;;  %vm714_vm1 = vcmask 1047559  }
 0x141   : > { %v479_v60 = vsel %vm292_vm0, %v459_v56, 0.0  ;;  %v476_v61 = vsel %vm292_vm0, %v458_v58, 0.0 }
 0x142   : > { %v482_v63 = vsel %vm292_vm0, %v460_v62, 0.0 }
 0x144   : > { %468 = vadd.xlane.f32.xlu1 %v467_v57  ;;  %474 = vadd.xlane.f32.xlu0 %v473_v55 }
 0x148   : > { %477 = vadd.xlane.f32.xlu1 %v476_v61  ;;  %480 = vadd.xlane.f32.xlu0 %v479_v60 }
 0x14c   : > { %483 = vadd.xlane.f32.xlu1 %v482_v63 }
 0x1c9   : > { %v466_v0 = vpop.xlane.xlu0 %465 }
 0x1ca   : > { %v491_v1 = vrot.slane %v466_v0, 4 }
 0x1cc   : > { %v492_v2 = vmax.f32 %v466_v0, %v491_v1 }
 0x1cd   : > { %v472_v3 = vpop.xlane.xlu1 %471  ;;  %v463_v4 = vpop.xlane.xlu0 %462 }
 0x1ce   : > { %v493_v6 = vrot.slane %v492_v2, 2  ;;  %v503_v14 = vrot.slane %v472_v3, 4  ;;  %v485_v15 = vrot.slane %v463_v4, 4 }
 0x1d0   : > { %v494_v16 = vmax.f32 %v492_v2, %v493_v6  ;;  %v504_v17 = vmax.f32 %v472_v3, %v503_v14  ;;  %v486_v18 = vmax.f32 %v463_v4, %v485_v15 }
 0x1d1   : > { %v469_v19 = vpop.xlane.xlu1 %468  ;;  %v475_v20 = vpop.xlane.xlu0 %474 }
 0x1d2   : > { %v495_v21 = vrot.slane %v494_v16, 1  ;;  %v505_v22 = vrot.slane %v504_v17, 2  ;;  %v487_v23 = vrot.slane %v486_v18, 2  ;;  %v497_v24 = vrot.slane %v469_v19, 4 }
 0x1d3   : > { %v509_v25 = vrot.slane %v475_v20, 4 }
 0x1d4   : > { %v496_v26 = vmax.f32 %v494_v16, %v495_v21  ;;  %v506_v27 = vmax.f32 %v504_v17, %v505_v22  ;;  %v488_v28 = vmax.f32 %v486_v18, %v487_v23  ;;  %v498_v29 = vmax.f32 %v469_v19, %v497_v24 }
 0x1d5   : > { %v510_v30 = vmax.f32 %v475_v20, %v509_v25  ;;  %v478_v31 = vpop.xlane.xlu1 %477  ;;  %v481_v32 = vpop.xlane.xlu0 %480 }
 0x1d6   : > { %v534_v33 = vsub.f32 %v466_v0, %v496_v26  ;;  %v507_v34 = vrot.slane %v506_v27, 1  ;;  %v489_v35 = vrot.slane %v488_v28, 1  ;;  %v499_v36 = vrot.slane %v498_v29, 2 }
 0x1d7   : > { %v511_v37 = vrot.slane %v510_v30, 2  ;;  %v515_v38 = vrot.slane %v478_v31, 4  ;;  %v521_v39 = vrot.slane %v481_v32, 4 }
 0x1d8   : > { %v543_v40 = vmul.f32 1.442695, %v534_v33  ;;  %v508_v41 = vmax.f32 %v506_v27, %v507_v34  ;;  %v490_v42 = vmax.f32 %v488_v28, %v489_v35  ;;  %v500_v43 = vmax.f32 %v498_v29, %v499_v36 }
 0x1d9   : > { %v512_v44 = vmax.f32 %v510_v30, %v511_v37  ;;  %v516_v45 = vmax.f32 %v478_v31, %v515_v38  ;;  %v522_v46 = vmax.f32 %v481_v32, %v521_v39  ;;  %v484_v47 = vpop.xlane.xlu1 %483 }
 0x1da   : > { %977 = vpow2.f32 %v543_v40  ;;  %v536_v48 = vsub.f32 %v472_v3, %v508_v41  ;;  %v533_v49 = vsub.f32 %v463_v4, %v490_v42  ;;  %v501_v50 = vrot.slane %v500_v43, 1 }
 0x1db   : > { %v513_v51 = vrot.slane %v512_v44, 1  ;;  %v517_v52 = vrot.slane %v516_v45, 2  ;;  %v523_v53 = vrot.slane %v522_v46, 2  ;;  %v527_v54 = vrot.slane %v484_v47, 4 }
 0x1dc   : > { %v547_v55 = vmul.f32 1.442695, %v536_v48  ;;  %v541_v56 = vmul.f32 1.442695, %v533_v49  ;;  %v502_v57 = vmax.f32 %v500_v43, %v501_v50 }
 0x1dd   : > { %v514_v58 = vmax.f32 %v512_v44, %v513_v51  ;;  %v518_v59 = vmax.f32 %v516_v45, %v517_v52  ;;  %v524_v60 = vmax.f32 %v522_v46, %v523_v53  ;;  %v528_v61 = vmax.f32 %v484_v47, %v527_v54 }
 0x1de   : > { %979 = vpow2.f32 %v547_v55  ;;  %v535_v62 = vsub.f32 %v469_v19, %v502_v57 }
 0x1df   : > { %981 = vpow2.f32 %v541_v56  ;;  %v537_v63 = vsub.f32 %v475_v20, %v514_v58  ;;  %v519_v0 = vrot.slane %v518_v59, 1  ;;  %v525_v1 = vrot.slane %v524_v60, 1 }
 0x1e0   : > { %v545_v2 = vmul.f32 1.442695, %v535_v62  ;;  %v529_v3 = vrot.slane %v528_v61, 2 }
 0x1e1   : > { %v549_v4 = vmul.f32 1.442695, %v537_v63  ;;  %v520_v6 = vmax.f32 %v518_v59, %v519_v0  ;;  %v526_v14 = vmax.f32 %v524_v60, %v525_v1 }
 0x1e2   : > { %983 = vpow2.f32 %v545_v2  ;;  %v530_v15 = vmax.f32 %v528_v61, %v529_v3 }
 0x1e3   : > { %985 = vpow2.f32 %v549_v4  ;;  %v538_v16 = vsub.f32 %v478_v31, %v520_v6  ;;  %v539_v17 = vsub.f32 %v481_v32, %v526_v14 }
 0x1e4   : > { %v1388_v18 = vpop.eup %977  ;;  %v531_v21 = vrot.slane %v530_v15, 1 }
 0x1e5   : > { %v563_v22 = vrot.slane %v1388_v18, 4  ;;  %v551_v19 = vmul.f32 1.442695, %v538_v16  ;;  %v553_v23 = vmul.f32 1.442695, %v539_v17 }
 0x1e6   : > { %v532_v20 = vmax.f32 %v530_v15, %v531_v21 }
 0x1e7   : > { %v564_v24 = vadd.f32 %v1388_v18, %v563_v22  ;;  %987 = vpow2.f32 %v551_v19 }
 0x1e8   : > { %v1392_v25 = vpop.eup %979  ;;  %989 = vpow2.f32 %v553_v23  ;;  %v540_v26 = vsub.f32 %v484_v47, %v532_v20 }
 0x1e9   : > { %v1394_v27 = vpop.eup %981  ;;  %v565_v28 = vrot.slane %v564_v24, 2  ;;  %v575_v29 = vrot.slane %v1392_v25, 4 }
 0x1ea   : > { %v557_v30 = vrot.slane %v1394_v27, 4  ;;  %v555_v31 = vmul.f32 1.442695, %v540_v26 }
 0x1eb   : > { %v566_v32 = vadd.f32 %v565_v28, %v564_v24  ;;  %v576_v33 = vadd.f32 %v1392_v25, %v575_v29 }
 0x1ec   : > { %v1399_v34 = vpop.eup %983  ;;  %v558_v35 = vadd.f32 %v1394_v27, %v557_v30  ;;  %991 = vpow2.f32 %v555_v31 }
 0x1ed   : > { %v1402_v36 = vpop.eup %985  ;;  %v567_v37 = vrot.slane %v566_v32, 1  ;;  %v577_v38 = vrot.slane %v576_v33, 2  ;;  %v569_v39 = vrot.slane %v1399_v34, 4 }
 0x1ee   : > { %v559_v40 = vrot.slane %v558_v35, 2  ;;  %v581_v41 = vrot.slane %v1402_v36, 4 }
 0x1ef   : > { %v568_v42 = vadd.f32 %v567_v37, %v566_v32  ;;  %v578_v43 = vadd.f32 %v577_v38, %v576_v33  ;;  %v570_v44 = vadd.f32 %v1399_v34, %v569_v39 }
 0x1f0   : > { %v560_v45 = vadd.f32 %v559_v40, %v558_v35  ;;  %v582_v46 = vadd.f32 %v1402_v36, %v581_v41 }
 0x1f1   : > { %v1413_v47 = vpop.eup %987  ;;  %993 = vrcp.f32 %v568_v42  ;;  %v579_v48 = vrot.slane %v578_v43, 1  ;;  %v571_v49 = vrot.slane %v570_v44, 2 }
 0x1f2   : > { %v1415_v50 = vpop.eup %989  ;;  %v561_v51 = vrot.slane %v560_v45, 1  ;;  %v583_v52 = vrot.slane %v582_v46, 2  ;;  %v587_v53 = vrot.slane %v1413_v47, 4 }
 0x1f3   : > { %v580_v54 = vadd.f32 %v579_v48, %v578_v43  ;;  %v572_v55 = vadd.f32 %v571_v49, %v570_v44  ;;  %v593_v56 = vrot.slane %v1415_v50, 4 }
 0x1f4   : > { %v562_v57 = vadd.f32 %v561_v51, %v560_v45  ;;  %v584_v58 = vadd.f32 %v583_v52, %v582_v46  ;;  %v588_v59 = vadd.f32 %v1413_v47, %v587_v53 }
 0x1f5   : > { %995 = vrcp.f32 %v580_v54  ;;  %v573_v60 = vrot.slane %v572_v55, 1  ;;  %v594_v61 = vadd.f32 %v1415_v50, %v593_v56 }
 0x1f6   : > { %v1423_v62 = vpop.eup %991  ;;  %997 = vrcp.f32 %v562_v57  ;;  %v585_v63 = vrot.slane %v584_v58, 1  ;;  %v589_v0 = vrot.slane %v588_v59, 2 }
 0x1f7   : > { %v574_v1 = vadd.f32 %v573_v60, %v572_v55  ;;  %v595_v2 = vrot.slane %v594_v61, 2  ;;  %v599_v3 = vrot.slane %v1423_v62, 4 }
 0x1f8   : > { %v586_v4 = vadd.f32 %v585_v63, %v584_v58  ;;  %v590_v6 = vadd.f32 %v589_v0, %v588_v59 }
 0x1f9   : > { %999 = vrcp.f32 %v574_v1  ;;  %v596_v14 = vadd.f32 %v595_v2, %v594_v61  ;;  %v600_v15 = vadd.f32 %v1423_v62, %v599_v3 }
 0x1fa   : > { %1001 = vrcp.f32 %v586_v4  ;;  %v591_v16 = vrot.slane %v590_v6, 1 }
 0x1fb   : > { %v994_v17 = vpop.eup %993  ;;  %v597_v21 = vrot.slane %v596_v14, 1  ;;  %v601_v22 = vrot.slane %v600_v15, 2 }
 0x1fc   : > { %v608_v19 = vmul.f32 %v994_v17, %v1388_v18  ;;  %v592_v23 = vadd.f32 %v591_v16, %v590_v6 }
 0x1fd   : > { %v598_v20 = vadd.f32 %v597_v21, %v596_v14  ;;  %v602_v24 = vadd.f32 %v601_v22, %v600_v15 }
 0x1fe   : > { %623 = vst.msk [vmem:[%s1430_s28 + $0x8] sm:$0xff] %vm621_vm9, %v608_v19  ;;  %v631_v26 = vmul.f32 %v608_v19, %v1344_v8  ;;  %1003 = vrcp.f32 %v592_v23 }
 0x1ff   : > { %v996_v28 = vpop.eup %995  ;;  %1005 = vrcp.f32 %v598_v20  ;;  %v603_v29 = vrot.slane %v602_v24, 1 }
 0x200   : > { %v998_v30 = vpop.eup %997  ;;  %v612_v31 = vmul.f32 %v996_v28, %v1392_v25  ;;  %v645_v32 = vsel %vm292_vm0, %v631_v26, 0.0 }
 0x201   : > { %v606_v18 = vmul.f32 %v998_v30, %v1394_v27  ;;  %v604_v33 = vadd.f32 %v603_v29, %v602_v24  ;;  %v646_v35 = vrot.slane %v645_v32, 4 }
 0x202   : > { %625 = vst.msk [vmem:[%s1430_s28 + $0x18] sm:$0xff] %vm621_vm9, %v612_v31  ;;  %v633_v37 = vmul.f32 %v612_v31, %v1362_v12 }
 0x203   : > { %v1000_v8 = vpop.eup %999  ;;  %622 = vst.msk [vmem:[%s1430_s28] sm:$0xff] %vm621_vm9, %v606_v18  ;;  %v630_v38 = vmul.f32 %v606_v18, %v1334_v5  ;;  %1007 = vrcp.f32 %v604_v33  ;;  %v647_v39 = vadd.f32 %v646_v35, %v645_v32 }
 0x204   : > { %v1002_v25 = vpop.eup %1001  ;;  %v610_v40 = vmul.f32 %v1000_v8, %v1399_v34  ;;  %v659_v27 = vsel %vm292_vm0, %v633_v37, 0.0 }
 0x205   : > { %v614_v41 = vmul.f32 %v1002_v25, %v1402_v36  ;;  %v638_v42 = vsel %vm292_vm0, %v630_v38, 0.0  ;;  %v648_v43 = vrot.slane %v647_v39, 2  ;;  %v660_v44 = vrot.slane %v659_v27, 4 }
 0x206   : > { %624 = vst.msk [vmem:[%s1430_s28 + $0x10] sm:$0xff] %vm621_vm9, %v610_v40  ;;  %v632_v12 = vmul.f32 %v610_v40, %v1350_v10  ;;  %v639_v45 = vrot.slane %v638_v42, 4 }
 0x207   : > { %626 = vst.msk [vmem:[%s1430_s28 + $0x20] sm:$0xff] %vm621_vm9, %v614_v41  ;;  %v634_v5 = vmul.f32 %v614_v41, %v1339_v7  ;;  %v661_v46 = vadd.f32 %v660_v44, %v659_v27  ;;  %v649_v52 = vadd.f32 %v648_v43, %v647_v39 }
 0x208   : > { %v1004_v34 = vpop.eup %1003  ;;  %v640_v48 = vadd.f32 %v639_v45, %v638_v42  ;;  %v652_v36 = vsel %vm292_vm0, %v632_v12, 0.0 }
 0x209   : > { %v1006_v49 = vpop.eup %1005  ;;  %v616_v51 = vmul.f32 %v1004_v34, %v1413_v47  ;;  %v653_v53 = vrot.slane %v652_v36, 4  ;;  %v662_v54 = vrot.slane %v661_v46, 2  ;;  %v666_v56 = vsel %vm292_vm0, %v634_v5, 0.0 }
 0x20a   : > { %v618_v10 = vmul.f32 %v1006_v49, %v1415_v50  ;;  %v641_v55 = vrot.slane %v640_v48, 2  ;;  %v667_v60 = vrot.slane %v666_v56, 4  ;;  %v650_v63 = vrot.slane %v649_v52, 1 }
 0x20b   : > { %627 = vst.msk [vmem:[%s1430_s28 + $0x28] sm:$0xff] %vm621_vm9, %v616_v51  ;;  %v635_v7 = vmul.f32 %v616_v51, %v1347_v9  ;;  %v654_v57 = vadd.f32 %v653_v53, %v652_v36  ;;  %v663_v58 = vadd.f32 %v662_v54, %v661_v46 }
 0x20c   : > { %628 = vst.msk [vmem:[%s1430_s28 + $0x30] sm:$0xff] %vm621_vm9, %v618_v10  ;;  %v636_v59 = vmul.f32 %v618_v10, %v1353_v11  ;;  %v642_v47 = vadd.f32 %v641_v55, %v640_v48  ;;  %v668_v3 = vadd.f32 %v667_v60, %v666_v56 }
 0x20d   : > { %v1008_v61 = vpop.eup %1007  ;;  %v655_v0 = vrot.slane %v654_v57, 2  ;;  %v673_v50 = vsel %vm292_vm0, %v635_v7, 0.0  ;;  %v664_v6 = vrot.slane %v663_v58, 1 }
 0x20e   : > { %v620_v1 = vmul.f32 %v1008_v61, %v1423_v62  ;;  %v643_v2 = vrot.slane %v642_v47, 1  ;;  %v674_v4 = vrot.slane %v673_v50, 4  ;;  %v680_v14 = vsel %vm292_vm0, %v636_v59, 0.0 }
 0x20f   : > { %v656_v9 = vadd.f32 %v655_v0, %v654_v57  ;;  %v669_v16 = vrot.slane %v668_v3, 2  ;;  %v681_v22 = vrot.slane %v680_v14, 4  ;;  %v651_v62 = vadd.f32 %v650_v63, %v649_v52 }
 0x210   : > { %629 = vst.msk [vmem:[%s1430_s28 + $0x38] sm:$0xff] %vm621_vm9, %v620_v1  ;;  %v637_v11 = vmul.f32 %v620_v1, %v1367_v13  ;;  %v644_v15 = vadd.f32 %v643_v2, %v642_v47  ;;  %v675_v17 = vadd.f32 %v674_v4, %v673_v50  ;;  %v665_v29 = vadd.f32 %v664_v6, %v663_v58 }
 0x211   : > { %v657_v21 = vrot.slane %v656_v9, 1  ;;  %v670_v19 = vadd.f32 %v669_v16, %v668_v3  ;;  %v682_v26 = vadd.f32 %v681_v22, %v680_v14 }
 0x212   : > { %v676_v23 = vrot.slane %v675_v17, 2  ;;  %v687_v20 = vsel %vm292_vm0, %v637_v11, 0.0  ;;  %v703_v31 = vsel %vm702_vm10, %v651_v62, %v644_v15 }
 0x213   : > { %v658_v24 = vadd.f32 %v657_v21, %v656_v9  ;;  %v688_v28 = vrot.slane %v687_v20, 4  ;;  %v671_v30 = vrot.slane %v670_v19, 1  ;;  %v683_v32 = vrot.slane %v682_v26, 2 }
 0x214   : > { %v677_v13 = vadd.f32 %v676_v23, %v675_v17 }
 0x215   : > { %v689_v18 = vadd.f32 %v688_v28, %v687_v20  ;;  %v705_v33 = vsel %vm704_vm11, %v658_v24, %v703_v31  ;;  %v672_v35 = vadd.f32 %v671_v30, %v670_v19  ;;  %v684_v38 = vadd.f32 %v683_v32, %v682_v26 }
 0x216   : > { %v678_v37 = vrot.slane %v677_v13, 1  ;;  %v707_v8 = vsel %vm706_vm12, %v665_v29, %v705_v33 }
 0x217   : > { %v690_v39 = vrot.slane %v689_v18, 2  ;;  %v709_v40 = vsel %vm708_vm13, %v672_v35, %v707_v8  ;;  %v685_v27 = vrot.slane %v684_v38, 1 }
 0x218   : > { %v679_v25 = vadd.f32 %v678_v37, %v677_v13 }
 0x219   : > { %v691_v41 = vadd.f32 %v690_v39, %v689_v18  ;;  %v686_v42 = vadd.f32 %v685_v27, %v684_v38 }
 0x21a   : > { %v711_v44 = vsel %vm710_vm14, %v679_v25, %v709_v40 }
 0x21b   : > { %v692_v43 = vrot.slane %v691_v41, 1  ;;  %v713_v45 = vsel %vm712_vm15, %v686_v42, %v711_v44 }
 0x21d   : > { %v693_v12 = vadd.f32 %v692_v43, %v691_v41 }
 0x21f   : > { %v715_v5 = vsel %vm714_vm1, %v693_v12, %v713_v45 }
 0x220   : > { %717 = vst.msk [vmem:[%s258_s11] sm:$0xff] %vm292_vm0, %v715_v5 }
 0x221   : > { %1080 = shalt.err (!%p1077_p9)
}
 0x222   : > { %s1081_s23 = scalar_lea.hbm %s1478_s26, 128  ;;  %s1085_s29 = scalar_lea.hbm %s1527_s4, 256 }
 0x223   : > { %p1082_p1 = scmp.ne.s32.totalorder %s1478_s26, %s1081_s23  ;;  %p1086_p11 = scmp.lt.u32.totalorder %s1478_s26, %s1527_s4 }
 0x224   : > { %p1087_p2 = scmp.lt.u32.totalorder %s1085_s29, %s1081_s23  ;;  %p1089_p6 = scmp.lt.u32.totalorder %s1081_s23, %s1478_s26 }
 0x225   : > { %p1083_p0 = pnand %p1082_p1, %p1268_p12 }
 0x226   : > { %p1088_p4 = por %p1087_p2, %p1086_p11 }
 0x227   : > { %p1084_p5 = pneg %p1083_p0 }
 0x228   : > { %p1090_p8 = por %p1089_p6, %p1088_p4 }
 0x22a   : > { %p1091_p10 = pnand %p1090_p8, %p1084_p5 }
 0x22c   : > { %1094 = shalt.err (!%p1091_p10)
}
 0x22d   : > { %924 = dma.vmem_to_hbm [thread:$0]  (%p1268_p12), %s1480_s12, 128, %s1478_s26, %s719_s16  }
 0x22e PF: > { %s753_s10 = sand.u32 1, %s1125_s18   ;;  %p1544_p13 = scmp.ne.s32.totalorder %s1533_s25, 0 }
 0x22f   : > { %p1545_p3 = scmp.ge.s32.totalorder %s1137_s21, 2  ;;  %s754_s11 = scalar_lea.sflag [#allocation4], %s753_s10 }
 0x231   : > { %p935_p7 = pnand %p1545_p3, %p1544_p13 }
 0x233   : > { %1120 = dma.done.wait (!%p935_p7), %s754_s11, 128  }
 0x234   : > { %1122 = vsyncadd (!%p935_p7), %s754_s11, 4294967168  ;;  %p20_p9 = scmp.ge.s32.totalorder %s1230_s30, 4   ;;  %s1546_s18 = smov %s1129_s19 }
 0x235   : > { %s1547_s19 = smov %s1133_s20  ;;  %s1548_s20 = smov %s1264_s8 }
 0x236   : > { %s1549_s21 = smov %s1230_s30  ;;  %22 = sbr.rel (!%p20_p9) target bundleno = 6 (0x6), region = 97 }
 0x23d   :  { %767 = vsyncpa [#allocation3], 1 }
 0x23e   :  { %769 = vsyncpa [#allocation3 + $0x1], 1 }
 0x23f   :  { %770 = vsyncpa [#allocation6], 1 }
 0x240   :  { %771 = vsyncpa [#allocation4], 1 }
 0x241   :  { %773 = vsyncpa [#allocation4 + $0x1], 1 }

</bundles_post_ra>
